<compile_context>
chip_gen: v6e
topology: v6e:2x2x1
jax: 0.10.0
libtpu: 0.0.40
codegen_flags: <defaults>
</compile_context>

<pallas_src>
import functools

import jax
import jax.numpy as jnp
from jax.experimental import pallas as pl
from jax.experimental.pallas import tpu as pltpu


def _round_up(x: int, m: int) -> int:
    return ((x + m - 1) // m) * m


@functools.lru_cache(maxsize=None)
def _vmem_limit_bytes() -> int:
    """VMEM budget with headroom: ~3/4 of physical, capped at 100 MiB."""
    try:
        cap = int(pltpu.get_tpu_info().vmem_capacity_bytes)
    except Exception:
        return 64 * 1024 * 1024  # conservative fallback (works on all generations)
    return min(cap * 3 // 4, 100 * 1024 * 1024)


def _fused_mlp_kernel(*refs, num_layers: int, k_real: int, out_dim: int):
    """refs = (x, w0, b0, ..., w{L-1}, b{L-1}, out[, xpad_scratch]).

    Computes one M-tile of the whole MLP. Weights/biases are full VMEM-resident blocks;
    intermediate activations live in registers/VMEM only.
    """
    n_in = 1 + 2 * num_layers
    x_ref = refs[0]
    o_ref = refs[n_in]
    has_pad_scratch = len(refs) == n_in + 2

    if has_pad_scratch:
        # Zero-pad the (tm, k_real) bf16 tile up to the lane-aligned width expected by
        # the first weight, entirely inside VMEM (padding never travels over HBM).
        xpad_ref = refs[n_in + 1]
        xpad_ref[...] = jnp.zeros_like(xpad_ref)
        xpad_ref[:, :k_real] = x_ref[...]
        h = xpad_ref[...]
    else:
        h = x_ref[...]

    for i in range(num_layers):
        w_ref = refs[1 + 2 * i]  # (in_p, out_p) bf16, pre-transposed
        b_ref = refs[2 + 2 * i]  # (1, out_p)  f32
        y = jnp.dot(h, w_ref[...], preferred_element_type=jnp.float32) + b_ref[...]
        if i < num_layers - 1:
            h = jnp.maximum(y, 0.0).astype(jnp.bfloat16)
        else:
            # Store only the real output columns (unpadded output stream in HBM).
            o_ref[...] = y[:, :out_dim].astype(o_ref.dtype)


def mlp_forward_pallas(x, padded_params, *, output_dim: int, tile_m: int = 512):
    """x: (..., input_dim). padded_params: list of (w bf16 (in_p,out_p), b f32 (1,out_p))."""
    orig_shape = x.shape
    x2d = x.reshape(-1, orig_shape[-1]).astype(jnp.bfloat16)  # bf16 HBM read stream
    M, K = x2d.shape
    num_layers = len(padded_params)
    Kp = padded_params[0][0].shape[0]  # lane-aligned width of the first weight's input

    # ---- M tiling -------------------------------------------------------------
    Mp = _round_up(max(M, 8), 8)
    if Mp > tile_m:
        tm = tile_m
        Mp = _round_up(M, tile_m)
    else:
        tm = Mp
    # Give the "parallel" M axis >= 2 grid steps when there is meaningful work, so both
    # TensorCores on v7x get a share (harmless ~0.35us extra step elsewhere).
    if Mp // tm < 2 and tm >= 128 and tm % 16 == 0:
        tm //= 2

    # Single fused pad (bf16) only when needed; skipped entirely when M % tm == 0.
    x_in = x2d if Mp == M else jnp.pad(x2d, ((0, Mp - M), (0, 0)))

    # ---- specs ----------------------------------------------------------------
    in_specs = [pl.BlockSpec((tm, K), lambda i: (i, 0))]  # activations: unpadded K, tiled over M
    flat_params = []
    for (w_p, b_p) in padded_params:
        in_specs.append(pl.BlockSpec(w_p.shape, lambda i: (0, 0)))  # full weight, VMEM-resident
        in_specs.append(pl.BlockSpec(b_p.shape, lambda i: (0, 0)))  # bias row, VMEM-resident
        flat_params.extend([w_p, b_p])

    scratch_shapes = []
    if Kp != K:
        scratch_shapes.append(pltpu.VMEM((tm, Kp), jnp.bfloat16))  # in-kernel K padding

    kernel = functools.partial(
        _fused_mlp_kernel, num_layers=num_layers, k_real=K, out_dim=output_dim)

    y = pl.pallas_call(
        kernel,
        out_shape=jax.ShapeDtypeStruct((Mp, output_dim), jnp.float32),
        grid_spec=pltpu.PrefetchScalarGridSpec(
            num_scalar_prefetch=0,
            grid=(Mp // tm,),
            in_specs=in_specs,
            out_specs=pl.BlockSpec((tm, output_dim), lambda i: (i, 0)),
            scratch_shapes=scratch_shapes,
        ),
        compiler_params=pltpu.CompilerParams(
            dimension_semantics=("parallel",),
            vmem_limit_bytes=_vmem_limit_bytes(),
        ),
    )(x_in, *flat_params)

    if Mp != M:
        y = y[:M]
    return y.reshape(*orig_shape[:-1], output_dim)


class MLP:
    """JAX/Pallas mirror of the PyTorch MTTR MLP module."""

    def __init__(self, input_dim, hidden_dim, output_dim, num_layers, key):
        self.num_layers = num_layers
        self.output_dim = output_dim
        h = [hidden_dim] * (num_layers - 1)
        dims_in = [input_dim] + h
        dims_out = h + [output_dim]
        n_layers = len(dims_in)

        def _pad_feature(d, *, interior):
            # Interior (hidden) dims never touch HBM: pad to 256 when large so the
            # 2x256x256 MXUs on v6e/v7x are fully fed; otherwise 128 (lane width).
            if interior and d >= 256:
                return _round_up(d, 256)
            return _round_up(d, 128)

        self.params = []          # torch-layout (out, in) f32 weights, for reference check
        self.padded_params = []   # pre-transposed (in_p, out_p) bf16 weights + (1, out_p) f32 bias
        for idx, (n, k) in enumerate(zip(dims_in, dims_out)):
            key, wk, bk = jax.random.split(key, 3)
            # deterministic init roughly matching nn.Linear's U(-1/sqrt(n), 1/sqrt(n))
            bound = 1.0 / jnp.sqrt(jnp.float32(n))
            w = jax.random.uniform(wk, (k, n), jnp.float32, -bound, bound)  # (out, in) like torch
            b = jax.random.uniform(bk, (k,), jnp.float32, -bound, bound)
            self.params.append((w, b))

            # Pre-transpose + zero-pad feature dims, pre-cast weight to bf16 once.
            # Zero rows/cols + zero bias padding keep the un-padded slice exact.
            in_p = _pad_feature(n, interior=(idx > 0))
            out_p = _pad_feature(k, interior=(idx < n_layers - 1))
            w_pad = jnp.zeros((in_p, out_p), jnp.float32).at[:n, :k].set(w.T)
            b_pad = jnp.zeros((1, out_p), jnp.float32).at[0, :k].set(b)
            self.padded_params.append((w_pad.astype(jnp.bfloat16), b_pad))

        self._forward = jax.jit(
            functools.partial(mlp_forward_pallas, output_dim=output_dim)
        )

    def __call__(self, x):
        return self._forward(x, self.padded_params)


def _reference_mlp(x, params, num_layers):
    # Pure-JAX f32 reference for sanity checking.
    orig_shape = x.shape
    x2d = x.reshape(-1, orig_shape[-1])
    for i, (w, b) in enumerate(params):
        y = x2d @ w.T + b
        x2d = jnp.maximum(y, 0.0) if i < num_layers - 1 else y
    return x2d.reshape(*orig_shape[:-1], params[-1][0].shape[0])


if __name__ == "__main__":
    key = jax.random.PRNGKey(0)
    key, xkey, pkey = jax.random.split(key, 3)

    # Small shapes consistent with the module: (batch=2, seq=8, input_dim=16)
    batch, seq = 2, 8
    input_dim, hidden_dim, output_dim, num_layers = 16, 32, 8, 3

    x = jax.random.normal(xkey, (batch, seq, input_dim), jnp.float32)

    mlp = MLP(input_dim, hidden_dim, output_dim, num_layers, pkey)
    out = jax.block_until_ready(mlp(x))

    ref = _reference_mlp(x, mlp.params, num_layers)
    assert out.shape == (batch, seq, output_dim)
    assert out.dtype == jnp.float32
    # bf16 matmul operands / bf16 weights (f32 accumulation) -> relaxed tolerance vs f32 ref.
    err = float(jnp.max(jnp.abs(out - ref)))
    assert jnp.allclose(out, ref, atol=3e-2, rtol=3e-2), err

    print("KERNEL_OK")
</pallas_src>

<mosaic_0001>
module attributes {stable_mosaic.version = 11 : i64} {
  func.func @_fused_mlp_kernel(%arg0: i32, %arg1: memref<16x16xbf16, #tpu.memory_space<vmem>>, %arg2: memref<128x128xbf16, #tpu.memory_space<vmem>>, %arg3: memref<1x128xf32, #tpu.memory_space<vmem>>, %arg4: memref<128x128xbf16, #tpu.memory_space<vmem>>, %arg5: memref<1x128xf32, #tpu.memory_space<vmem>>, %arg6: memref<128x128xbf16, #tpu.memory_space<vmem>>, %arg7: memref<1x128xf32, #tpu.memory_space<vmem>>, %arg8: memref<16x8xf32, #tpu.memory_space<vmem>>, %arg9: memref<16x128xbf16, #tpu.memory_space<vmem>>) attributes {dimension_semantics = [#tpu.dimension_semantics<parallel>], iteration_bounds = array<i64: 1>, scalar_prefetch = 0 : i64, scratch_operands = 1 : i64, tpu.core_type = #tpu.core_type<tc>, window_params = [{transform_indices = @transform_0, window_bounds = array<i64: 16, 16>}, {pipeline_mode = #tpu.pipeline_mode<synchronous>, transform_indices = @transform_1, window_bounds = array<i64: 128, 128>}, {pipeline_mode = #tpu.pipeline_mode<synchronous>, transform_indices = @transform_2, window_bounds = array<i64: 1, 128>}, {pipeline_mode = #tpu.pipeline_mode<synchronous>, transform_indices = @transform_3, window_bounds = array<i64: 128, 128>}, {pipeline_mode = #tpu.pipeline_mode<synchronous>, transform_indices = @transform_4, window_bounds = array<i64: 1, 128>}, {pipeline_mode = #tpu.pipeline_mode<synchronous>, transform_indices = @transform_5, window_bounds = array<i64: 128, 128>}, {pipeline_mode = #tpu.pipeline_mode<synchronous>, transform_indices = @transform_6, window_bounds = array<i64: 1, 128>}, {transform_indices = @transform_7, window_bounds = array<i64: 16, 8>}]} {
    %cst = arith.constant 0.000000e+00 : bf16
    %0 = vector.broadcast %cst : bf16 to vector<16x128xbf16>
    %c0 = arith.constant 0 : index
    %c0_0 = arith.constant 0 : index
    %1 = vector.load %arg9[%c0, %c0_0] : memref<16x128xbf16, #tpu.memory_space<vmem>>, vector<16x128xbf16>
    tpu.vector_store %arg9[%c0, %c0_0], %0 {strides = array<i32>} : memref<16x128xbf16, #tpu.memory_space<vmem>>, vector<16x128xbf16>,
    %c0_1 = arith.constant 0 : index
    %c0_2 = arith.constant 0 : index
    %2 = vector.load %arg1[%c0_1, %c0_2] : memref<16x16xbf16, #tpu.memory_space<vmem>>, vector<16x16xbf16>
    %c0_3 = arith.constant 0 : index
    %c0_4 = arith.constant 0 : index
    %3 = vector.load %arg9[%c0_3, %c0_4] : memref<16x128xbf16, #tpu.memory_space<vmem>>, vector<16x16xbf16>
    tpu.vector_store %arg9[%c0_3, %c0_4], %2 {strides = array<i32>} : memref<16x128xbf16, #tpu.memory_space<vmem>>, vector<16x16xbf16>,
    %c0_5 = arith.constant 0 : index
    %c0_6 = arith.constant 0 : index
    %4 = vector.load %arg9[%c0_5, %c0_6] : memref<16x128xbf16, #tpu.memory_space<vmem>>, vector<16x128xbf16>
    %c0_7 = arith.constant 0 : index
    %c0_8 = arith.constant 0 : index
    %5 = vector.load %arg2[%c0_7, %c0_8] : memref<128x128xbf16, #tpu.memory_space<vmem>>, vector<128x128xbf16>
    %cst_9 = arith.constant dense<0.000000e+00> : vector<16x128xf32>
    %6 = tpu.matmul %4, %5, %cst_9 {dimension_numbers = #tpu.dot_dimension_numbers<[1], [0], [0], [1], [0, 0, 1, 1], [], []>} : vector<16x128xbf16>, vector<128x128xbf16>, vector<16x128xf32> -> vector<16x128xf32>
    %c0_10 = arith.constant 0 : index
    %c0_11 = arith.constant 0 : index
    %7 = vector.load %arg3[%c0_10, %c0_11] : memref<1x128xf32, #tpu.memory_space<vmem>>, vector<1x128xf32>
    %8 = vector.broadcast %7 : vector<1x128xf32> to vector<16x128xf32>
    %9 = arith.addf %6, %8 : vector<16x128xf32>
    %cst_12 = arith.constant 0.000000e+00 : f32
    %10 = vector.broadcast %cst_12 : f32 to vector<16x128xf32>
    %11 = arith.maximumf %9, %10 : vector<16x128xf32>
    %12 = arith.truncf %11 : vector<16x128xf32> to vector<16x128xbf16>
    %c0_13 = arith.constant 0 : index
    %c0_14 = arith.constant 0 : index
    %13 = vector.load %arg4[%c0_13, %c0_14] : memref<128x128xbf16, #tpu.memory_space<vmem>>, vector<128x128xbf16>
    %cst_15 = arith.constant dense<0.000000e+00> : vector<16x128xf32>
    %14 = tpu.matmul %12, %13, %cst_15 {dimension_numbers = #tpu.dot_dimension_numbers<[1], [0], [0], [1], [0, 0, 1, 1], [], []>} : vector<16x128xbf16>, vector<128x128xbf16>, vector<16x128xf32> -> vector<16x128xf32>
    %c0_16 = arith.constant 0 : index
    %c0_17 = arith.constant 0 : index
    %15 = vector.load %arg5[%c0_16, %c0_17] : memref<1x128xf32, #tpu.memory_space<vmem>>, vector<1x128xf32>
    %16 = vector.broadcast %15 : vector<1x128xf32> to vector<16x128xf32>
    %17 = arith.addf %14, %16 : vector<16x128xf32>
    %cst_18 = arith.constant 0.000000e+00 : f32
    %18 = vector.broadcast %cst_18 : f32 to vector<16x128xf32>
    %19 = arith.maximumf %17, %18 : vector<16x128xf32>
    %20 = arith.truncf %19 : vector<16x128xf32> to vector<16x128xbf16>
    %c0_19 = arith.constant 0 : index
    %c0_20 = arith.constant 0 : index
    %21 = vector.load %arg6[%c0_19, %c0_20] : memref<128x128xbf16, #tpu.memory_space<vmem>>, vector<128x128xbf16>
    %cst_21 = arith.constant dense<0.000000e+00> : vector<16x128xf32>
    %22 = tpu.matmul %20, %21, %cst_21 {dimension_numbers = #tpu.dot_dimension_numbers<[1], [0], [0], [1], [0, 0, 1, 1], [], []>} : vector<16x128xbf16>, vector<128x128xbf16>, vector<16x128xf32> -> vector<16x128xf32>
    %c0_22 = arith.constant 0 : index
    %c0_23 = arith.constant 0 : index
    %23 = vector.load %arg7[%c0_22, %c0_23] : memref<1x128xf32, #tpu.memory_space<vmem>>, vector<1x128xf32>
    %24 = vector.broadcast %23 : vector<1x128xf32> to vector<16x128xf32>
    %25 = arith.addf %22, %24 : vector<16x128xf32>
    %26 = vector.extract_strided_slice %25 {offsets = [0, 0], sizes = [16, 8], strides = [1, 1]} : vector<16x128xf32> to vector<16x8xf32>
    %c0_24 = arith.constant 0 : index
    %c0_25 = arith.constant 0 : index
    %27 = vector.load %arg8[%c0_24, %c0_25] : memref<16x8xf32, #tpu.memory_space<vmem>>, vector<16x8xf32>
    tpu.vector_store %arg8[%c0_24, %c0_25], %26 {strides = array<i32>} : memref<16x8xf32, #tpu.memory_space<vmem>>, vector<16x8xf32>,
    return
  }
  func.func @transform_0(%arg0: i32) -> (i32, i32) {
    %c0_i32 = arith.constant 0 : i32
    %c0_i32_0 = arith.constant 0 : i32
    return %arg0, %c0_i32 : i32, i32
  }
  func.func @transform_1(%arg0: i32) -> (i32, i32) {
    %c0_i32 = arith.constant 0 : i32
    %c0_i32_0 = arith.constant 0 : i32
    %c0_i32_1 = arith.constant 0 : i32
    return %c0_i32, %c0_i32_0 : i32, i32
  }
  func.func @transform_2(%arg0: i32) -> (i32, i32) {
    %c0_i32 = arith.constant 0 : i32
    %c0_i32_0 = arith.constant 0 : i32
    %c0_i32_1 = arith.constant 0 : i32
    return %c0_i32, %c0_i32_0 : i32, i32
  }
  func.func @transform_3(%arg0: i32) -> (i32, i32) {
    %c0_i32 = arith.constant 0 : i32
    %c0_i32_0 = arith.constant 0 : i32
    %c0_i32_1 = arith.constant 0 : i32
    return %c0_i32, %c0_i32_0 : i32, i32
  }
  func.func @transform_4(%arg0: i32) -> (i32, i32) {
    %c0_i32 = arith.constant 0 : i32
    %c0_i32_0 = arith.constant 0 : i32
    %c0_i32_1 = arith.constant 0 : i32
    return %c0_i32, %c0_i32_0 : i32, i32
  }
  func.func @transform_5(%arg0: i32) -> (i32, i32) {
    %c0_i32 = arith.constant 0 : i32
    %c0_i32_0 = arith.constant 0 : i32
    %c0_i32_1 = arith.constant 0 : i32
    return %c0_i32, %c0_i32_0 : i32, i32
  }
  func.func @transform_6(%arg0: i32) -> (i32, i32) {
    %c0_i32 = arith.constant 0 : i32
    %c0_i32_0 = arith.constant 0 : i32
    %c0_i32_1 = arith.constant 0 : i32
    return %c0_i32, %c0_i32_0 : i32, i32
  }
  func.func @transform_7(%arg0: i32) -> (i32, i32) {
    %c0_i32 = arith.constant 0 : i32
    %c0_i32_0 = arith.constant 0 : i32
    return %arg0, %c0_i32 : i32, i32
  }
}

</mosaic_0001>

<bundles_post_ra>
// kernel: mlp_forward_pallas.1
= control target key start
LH: loop header
LB: loop body
LE: loop exit
PB: predicated region body
PF: predicated region fallthrough
CT: control target
= control target key end

     0   :  { %12 = vsyncpa [#allocation4], 0  ;;  %s792_s0 = inlined_call_operand.vmem [shape: bf16[16,16], index: 0, kind: input, shape index: {}]   ;;  %s793_s1 = inlined_call_operand.hbm [shape: bf16[128,128], index: 1, kind: input, shape index: {}]   ;;  %s794_s2 = inlined_call_operand.vmem [shape: f32[1,128], index: 2, kind: input, shape index: {}]   ;;  %s795_s3 = inlined_call_operand.hbm [shape: bf16[128,128], index: 3, kind: input, shape index: {}]   ;;  %s796_s4 = inlined_call_operand.vmem [shape: f32[1,128], index: 4, kind: input, shape index: {}]   ;;  %s797_s5 = inlined_call_operand.hbm [shape: bf16[128,128], index: 5, kind: input, shape index: {}]   ;;  %s798_s6 = inlined_call_operand.vmem [shape: f32[1,128], index: 6, kind: input, shape index: {}]   ;;  %s799_s7 = inlined_call_operand.hbm [shape: f32[16,8], index: 7, kind: output, shape index: {}]  }
   0x1   :  { %13 = vsyncpa [#allocation7], 0 }
   0x2   :  { %14 = vsyncpa [#allocation5], 0  ;;  %s684_s24 = smov [#allocation6]   ;;  %s685_s26 = smov [#allocation3]  }
   0x3   :  { %s36_s25 = sshll.u32 %s684_s24, 4  ;;  %s22_s27 = sshll.u32 %s685_s26, 4  ;;  %s37_s25 = int_to_ptr.vmem [resolvable:$true] %s36_s25  ;;  %s23_s27 = int_to_ptr.vmem [resolvable:$true] %s22_s27 }
   0x4   :  { %s606_s28 = scalar_lea.vmem %s37_s25, 1024  ;;  %p611_p1 = scmp.lt.s32.totalorder %s37_s25, %s37_s25 }
   0x5   :  { %p607_p0 = scmp.ne.s32.totalorder %s37_s25, %s606_s28  ;;  %p612_p2 = scmp.lt.s32.totalorder %s606_s28, %s606_s28 }
   0x7   :  { %p613_p3 = por %p612_p2, %p611_p1 }
   0x9   :  { %p614_p4 = pnand %p613_p3, %p607_p0 }
   0xb   :  { %617 = shalt.err (!%p614_p4)
}
   0xc   :  { %s686_s29 = smov 64   ;;  %s687_s30 = smov 4  }
   0xd   :  { %42 = dma.hbm_to_vmem [thread:$0]  %s795_s3, 1024, %s37_s25, [#allocation7], %s686_s29, %s686_s29, %s687_s30  }
   0xe   :  { %s626_s10 = scalar_lea.vmem %s23_s27, 1024  ;;  %p631_p6 = scmp.lt.s32.totalorder %s23_s27, %s23_s27 }
   0xf   :  { %p627_p5 = scmp.ne.s32.totalorder %s23_s27, %s626_s10  ;;  %p632_p7 = scmp.lt.s32.totalorder %s626_s10, %s626_s10 }
  0x11   :  { %p633_p8 = por %p632_p7, %p631_p6 }
  0x13   :  { %p634_p9 = pnand %p633_p8, %p627_p5 }
  0x15   :  { %637 = shalt.err (!%p634_p9)
}
  0x16   :  { %28 = dma.hbm_to_vmem [thread:$0]  %s793_s1, 1024, %s23_s27, [#allocation4], %s686_s29, %s686_s29, %s687_s30  }
  0x17   :  { %s688_s13 = smov [#allocation8]  }
  0x18   :  { %s50_s14 = sshll.u32 %s688_s13, 4  ;;  %s51_s14 = int_to_ptr.vmem [resolvable:$true] %s50_s14 }
  0x19   :  { %s646_s15 = scalar_lea.vmem %s51_s14, 1024  ;;  %p651_p11 = scmp.lt.s32.totalorder %s51_s14, %s51_s14 }
  0x1a   :  { %p647_p10 = scmp.ne.s32.totalorder %s51_s14, %s646_s15  ;;  %p652_p12 = scmp.lt.s32.totalorder %s646_s15, %s646_s15 }
  0x1c   :  { %p653_p13 = por %p652_p12, %p651_p11 }
  0x1e   :  { %p654_p0 = pnand %p653_p13, %p647_p10 }
  0x20   :  { %657 = shalt.err (!%p654_p0)
}
  0x21   :  { %56 = dma.hbm_to_vmem [thread:$0]  %s797_s5, 1024, %s51_s14, [#allocation7], %s686_s29, %s686_s29, %s687_s30  }
  0x22   :  { %678 = dma.done.wait [#allocation4], 1024  }
  0x23   :  { %679 = vsyncadd [#allocation4], 4294966272 }
  0x24   :  { %680 = dma.done.wait [#allocation7], 2048  }
  0x25   :  { %681 = vsyncadd [#allocation7], 4294965248  ;;  %v689_v0 = vmov 0.0   ;;  %vm690_vm0 = vmmov 0   ;;  %v691_v1 = vmov 0   ;;  %v573_v2 = vld [vmem:[#allocation3 + $0x38] sm:$0xff]  }
  0x26   :  { %502 = vmatprep.subr.bf16.mxu0 %v689_v0  ;;  %518 = vmatprep.mubr.msk.bf16.mxu0 %vm690_vm0, %v689_v0  ;;  %69 = vst [vmem:[#allocation2] sm:$0xf] %v691_v1  ;;  %70 = vst [vmem:[#allocation2 + $0x4] sm:$0xf] %v691_v1  ;;  %v574_v3 = vld [vmem:[#allocation3 + $0x30] sm:$0xff]   ;;  %v575_v4 = vld [vmem:[#allocation3 + $0x28] sm:$0xff]  }
  0x27   :  { %522 = vmatprep.subr.bf16.mxu1 %v689_v0  ;;  %538 = vmatprep.mubr.msk.bf16.mxu1 %vm690_vm0, %v689_v0  ;;  %vm73_vm1 = vcmask 125952   ;;  %v71_v5 = vld [vmem:[%s792_s0] sm:$0xf]  ;;  %v72_v6 = vld [vmem:[%s792_s0 + $0x4] sm:$0xf]  ;;  %v576_v8 = vld [vmem:[#allocation3 + $0x20] sm:$0xff]  }
  0x28   :  { %503 = vmatpush3.bf16.msra.mxu0 %v573_v2  ;;  %74 = vst.msk [vmem:[#allocation2] sm:$0xf] %vm73_vm1, %v71_v5  ;;  %75 = vst.msk [vmem:[#allocation2 + $0x4] sm:$0xf] %vm73_vm1, %v72_v6  ;;  %v582_v7 = vld [vmem:[#allocation6 + $0x38] sm:$0xff]   ;;  %v583_v9 = vld [vmem:[#allocation6 + $0x30] sm:$0xff]  }
  0x29   :  { %504 = vmatprep.subr.bf16.mxu0 %v689_v0  ;;  %523 = vmatpush3.bf16.msra.mxu1 %v582_v7  ;;  %v577_v10 = vld [vmem:[#allocation3 + $0x18] sm:$0xff]   ;;  %v584_v11 = vld [vmem:[#allocation6 + $0x28] sm:$0xff]   ;;  %v578_v12 = vld [vmem:[#allocation3 + $0x10] sm:$0xff]   ;;  %vm426_vm2 = vcmask 64512   ;;  %s692_s23 = smov [#allocation9]  }
  0x2a   :  { %524 = vmatprep.subr.bf16.mxu1 %v689_v0  ;;  %v585_v13 = vld [vmem:[#allocation6 + $0x20] sm:$0xff]   ;;  %v579_v14 = vld [vmem:[#allocation3 + $0x8] sm:$0xff]   ;;  %v586_v15 = vld [vmem:[#allocation6 + $0x18] sm:$0xff]   ;;  %s434_s24 = sshll.u32 %s692_s23, 4  ;;  %s435_s24 = int_to_ptr.vmem [resolvable:$true] %s434_s24 }
  0x2b   :  { %v580_v16 = vld [vmem:[#allocation3] sm:$0xff]   ;;  %v587_v18 = vld [vmem:[#allocation6 + $0x10] sm:$0xff]   ;;  %v588_v19 = vld [vmem:[#allocation6 + $0x8] sm:$0xff]   ;;  %p663_p2 = scmp.lt.s32.totalorder %s435_s24, %s435_s24 }
  0x2c   :  { %505 = vmatpush3.bf16.msra.mxu0 %v574_v3  ;;  %v589_v20 = vld [vmem:[#allocation6] sm:$0xff]   ;;  %v590_v21 = vld [vmem:[#allocation8 + $0x38] sm:$0xff]   ;;  %v591_v22 = vld [vmem:[#allocation8 + $0x30] sm:$0xff]  }
  0x2d   :  { %506 = vmatprep.subr.bf16.mxu0 %v689_v0  ;;  %525 = vmatpush3.bf16.msra.mxu1 %v583_v9  ;;  %v592_v23 = vld [vmem:[#allocation8 + $0x28] sm:$0xff]   ;;  %v593_v24 = vld [vmem:[#allocation8 + $0x20] sm:$0xff]   ;;  %v594_v25 = vld [vmem:[#allocation8 + $0x18] sm:$0xff]  }
  0x2e   :  { %526 = vmatprep.subr.bf16.mxu1 %v689_v0  ;;  %v447_v26 = vld [vmem:[%s794_s2] ss:$0 sm:$0xff]  ;;  %v595_v36 = vld [vmem:[#allocation8 + $0x10] sm:$0xff]   ;;  %v596_v37 = vld [vmem:[#allocation8 + $0x8] sm:$0xff]  }
  0x2f   :  { %v581_v17 = vld [vmem:[#allocation2] sm:$0xff]   ;;  %v597_v38 = vld [vmem:[#allocation8] sm:$0xff]  }
  0x30   :  { %507 = vmatpush3.bf16.msra.mxu0 %v575_v4  ;;  %v457_v39 = vld [vmem:[%s796_s4] ss:$0 sm:$0xff]  ;;  %s658_s4 = scalar_lea.vmem %s435_s24, 256 }
  0x31   :  { %508 = vmatprep.subr.bf16.mxu0 %v689_v0  ;;  %527 = vmatpush3.bf16.msra.mxu1 %v584_v11  ;;  %v466_v49 = vld [vmem:[%s798_s6] ss:$0 sm:$0xff]  ;;  %p659_p1 = scmp.ne.s32.totalorder %s435_s24, %s658_s4  ;;  %p664_p3 = scmp.lt.s32.totalorder %s658_s4, %s658_s4 }
  0x32   :  { %528 = vmatprep.subr.bf16.mxu1 %v689_v0 }
  0x33   :  { %p665_p4 = por %p664_p3, %p663_p2 }
  0x34   :  { %509 = vmatpush3.bf16.msra.mxu0 %v576_v8 }
  0x35   :  { %510 = vmatprep.subr.bf16.mxu0 %v689_v0  ;;  %529 = vmatpush3.bf16.msra.mxu1 %v585_v13  ;;  %p666_p5 = pnand %p665_p4, %p659_p1 }
  0x36   :  { %530 = vmatprep.subr.bf16.mxu1 %v689_v0 }
  0x38   :  { %511 = vmatpush3.bf16.msra.mxu0 %v577_v10 }
  0x39   :  { %512 = vmatprep.subr.bf16.mxu0 %v689_v0  ;;  %531 = vmatpush3.bf16.msra.mxu1 %v586_v15 }
  0x3a   :  { %532 = vmatprep.subr.bf16.mxu1 %v689_v0 }
  0x3c   :  { %513 = vmatpush3.bf16.msra.mxu0 %v578_v12 }
  0x3d   :  { %514 = vmatprep.subr.bf16.mxu0 %v689_v0  ;;  %533 = vmatpush3.bf16.msra.mxu1 %v587_v18 }
  0x3e   :  { %534 = vmatprep.subr.bf16.mxu1 %v689_v0 }
  0x40   :  { %515 = vmatpush3.bf16.msra.mxu0 %v579_v14 }
  0x41   :  { %516 = vmatprep.subr.bf16.mxu0 %v689_v0  ;;  %535 = vmatpush3.bf16.msra.mxu1 %v588_v19 }
  0x42   :  { %536 = vmatprep.subr.bf16.mxu1 %v689_v0 }
  0x44   :  { %517 = vmatpush3.bf16.msra.mxu0 %v580_v16 }
  0x45   :  { %542 = vmatprep.subr.bf16.mxu0 %v689_v0  ;;  %537 = vmatpush3.bf16.msra.mxu1 %v589_v20 }
  0x47   :  { %519 = vmatmul.mubr.bf16.vlgmr.msra.gmra.mxu0 %v581_v17 }
  0x48   :  { %558 = vmatprep.mubr.msk.bf16.mxu0 %vm690_vm0, %v689_v0  ;;  %543 = vmatpush3.bf16.msra.mxu0 %v590_v21 }
  0x49   :  { %544 = vmatprep.subr.bf16.mxu0 %v689_v0 }
  0x4c   :  { %545 = vmatpush3.bf16.msra.mxu0 %v591_v22 }
  0x4d   :  { %546 = vmatprep.subr.bf16.mxu0 %v689_v0 }
  0x50   :  { %547 = vmatpush3.bf16.msra.mxu0 %v592_v23 }
  0x51   :  { %548 = vmatprep.subr.bf16.mxu0 %v689_v0 }
  0x54   :  { %549 = vmatpush3.bf16.msra.mxu0 %v593_v24 }
  0x55   :  { %550 = vmatprep.subr.bf16.mxu0 %v689_v0 }
  0x58   :  { %551 = vmatpush3.bf16.msra.mxu0 %v594_v25 }
  0x59   :  { %552 = vmatprep.subr.bf16.mxu0 %v689_v0 }
  0x5c   :  { %553 = vmatpush3.bf16.msra.mxu0 %v595_v36 }
  0x5d   :  { %554 = vmatprep.subr.bf16.mxu0 %v689_v0 }
  0x60   :  { %555 = vmatpush3.bf16.msra.mxu0 %v596_v37 }
  0x61   :  { %556 = vmatprep.subr.bf16.mxu0 %v689_v0 }
  0x64   :  { %557 = vmatpush3.bf16.msra.mxu0 %v597_v38 }
 0x107   :  { %v189_v27 = vpop.f32.mrf.mxu0 }
 0x108   :  { %v190_v29 = vadd.f32 %v447_v26, %v189_v27 }
 0x109   :  { %v520_v28 = vpop.f32.mrf.mxu0 }
 0x10a   :  { %v196_v33 = vmax.f32 %v190_v29, 0.0 }
 0x10b   :  { %v192_v30 = vpop.f32.mrf.mxu0 }
 0x10c   :  { %v193_v31 = vadd.f32 %v447_v26, %v192_v30 }
 0x10d   :  { %v521_v32 = vpop.f32.mrf.mxu0 }
 0x10e   :  { %v197_v34 = vmax.f32 %v193_v31, 0.0 }
 0x110   :  { %v198_v35 = vpack.c.bf16 %v197_v34, %v196_v33 }
 0x112   :  { %539 = vmatmul.mubr.bf16.vlgmr.msra.gmra.mxu1 %v198_v35 }
 0x1d2   :  { %v304_v40 = vpop.f32.mrf.mxu1 }
 0x1d3   :  { %v305_v42 = vadd.f32 %v457_v39, %v304_v40 }
 0x1d4   :  { %v540_v41 = vpop.f32.mrf.mxu1 }
 0x1d5   :  { %v311_v46 = vmax.f32 %v305_v42, 0.0 }
 0x1d6   :  { %v307_v43 = vpop.f32.mrf.mxu1 }
 0x1d7   :  { %v308_v44 = vadd.f32 %v457_v39, %v307_v43 }
 0x1d8   :  { %v541_v45 = vpop.f32.mrf.mxu1 }
 0x1d9   :  { %v312_v47 = vmax.f32 %v308_v44, 0.0 }
 0x1db   :  { %v313_v48 = vpack.c.bf16 %v312_v47, %v311_v46 }
 0x1dd   :  { %559 = vmatmul.mubr.bf16.vlgmr.msra.gmra.mxu0 %v313_v48 }
 0x29d   :  { %v419_v50 = vpop.f32.mrf.mxu0 }
 0x29e   :  { %v420_v51 = vadd.f32 %v466_v49, %v419_v50 }
 0x29f   :  { %v560_v52 = vpop.f32.mrf.mxu0 }
 0x2a0   :  { %427 = vst.msk [vmem:[#allocation9] sm:$0xff] %vm426_vm2, %v420_v51 }
 0x2a1   :  { %v422_v53 = vpop.f32.mrf.mxu0 }
 0x2a2   :  { %v423_v54 = vadd.f32 %v466_v49, %v422_v53 }
 0x2a3   :  { %v561_v55 = vpop.f32.mrf.mxu0 }
 0x2a4   :  { %428 = vst.msk [vmem:[#allocation9 + $0x8] sm:$0xff] %vm426_vm2, %v423_v54 }
 0x2a5   :  { %669 = shalt.err (!%p666_p5)
}
 0x2a6   :  { %s693_s6 = smov 128   ;;  %s694_s25 = smov 8  }
 0x2a7   :  { %440 = dma.vmem_to_hbm [thread:$0]  %s435_s24, 256, %s799_s7, [#allocation5], %s693_s6, %s693_s6, %s694_s25  }
 0x2a8   :  { %682 = dma.done.wait [#allocation5], 256  }
 0x2a9   :  { %683 = vsyncadd [#allocation5], 4294967040 }
 0x2aa   :  { %444 = vsyncpa [#allocation4], 1 }
 0x2ab   :  { %445 = vsyncpa [#allocation7], 1 }
 0x2ac   :  { %446 = vsyncpa [#allocation5], 1 }

</bundles_post_ra>
